<compile_context>
chip_gen: v5e
topology: v5e:2x2
jax: 0.10.0
libtpu: 0.0.40
codegen_flags: <defaults>
</compile_context>

<pallas_src>
import jax
import jax.numpy as jnp
from jax.experimental import pallas as pl
from jax.experimental.pallas import tpu as pltpu

_LANES = 128
_SINGLE_BLOCK_BYTES = 2 << 20  # <= 2 MiB slab -> single-block fast path


def _clip_kernel(bounds_ref, x_ref, o_ref):
    # bounds_ref: (2,) f32 in SMEM — [min_val, max_val]
    lo = bounds_ref[0]
    hi = bounds_ref[1]
    x = x_ref[...]
    o_ref[...] = jnp.minimum(jnp.maximum(x, lo), hi).astype(o_ref.dtype)


def clipper_forward(x, min_val, max_val, *, tile_rows=1024):
    """Elementwise clamp of `x` between min_val and max_val via Pallas.

    Works for arbitrary-shaped float inputs; reshapes to a lane-dense
    (rows, 128) slab (padding only if needed), clips on-chip, restores shape.
    """
    # TODO(synk): integer dtypes with float bounds are computed in f32 and
    # truncated back; torch.clamp's integer promotion rules are not replicated.
    orig_shape = x.shape
    orig_dtype = x.dtype
    n = x.size

    bounds = jnp.asarray([min_val, max_val], dtype=jnp.float32)

    x_flat = jnp.ravel(x)
    pad = (-n) % _LANES
    if pad:
        x_flat = jnp.pad(x_flat, (0, pad))
    rows = (n + pad) // _LANES
    x2d = x_flat.reshape(rows, _LANES)

    slab_bytes = rows * _LANES * x2d.dtype.itemsize
    if slab_bytes <= _SINGLE_BLOCK_BYTES:
        # Fast path: one full-array block (block_shape == array dims is allowed
        # even when rows % 8 != 0).
        block_rows = rows
        grid = (1,)
    else:
        block_rows = tile_rows
        grid = (pl.cdiv(rows, block_rows),)  # ragged last block handled by Pallas

    out2d = pl.pallas_call(
        _clip_kernel,
        out_shape=jax.ShapeDtypeStruct((rows, _LANES), orig_dtype),
        grid_spec=pltpu.PrefetchScalarGridSpec(
            num_scalar_prefetch=1,
            grid=grid,
            in_specs=[pl.BlockSpec((block_rows, _LANES), lambda i, b: (i, 0))],
            out_specs=pl.BlockSpec((block_rows, _LANES), lambda i, b: (i, 0)),
        ),
        compiler_params=pltpu.CompilerParams(
            dimension_semantics=("parallel",)),
    )(bounds, x2d)

    if pad:
        out_flat = out2d.reshape(rows * _LANES)[:n]
    else:
        out_flat = out2d.reshape(n)
    return out_flat.reshape(orig_shape)


def clipper_inverse(x):
    """Identity, matching Clipper.inverse."""
    return x


if __name__ == "__main__":
    root = jax.random.PRNGKey(0)
    k1, k2, k3 = jax.random.split(root, 3)
    min_val, max_val = -1.0, 1.0

    # 1) Small NCHW observation (single-block fast path, no pad: 2048 % 128 == 0).
    x1 = jax.random.normal(k1, (2, 4, 16, 16), dtype=jnp.float32) * 3.0
    out1 = jax.block_until_ready(clipper_forward(x1, min_val, max_val))
    assert out1.shape == x1.shape and out1.dtype == x1.dtype
    assert bool(jnp.allclose(out1, jnp.clip(x1, min_val, max_val)))

    # 2) Ragged element count (exercises pad + trailing-slice path).
    x2 = jax.random.normal(k2, (3, 5, 17, 19), dtype=jnp.float32) * 3.0
    out2 = jax.block_until_ready(clipper_forward(x2, min_val, max_val))
    assert out2.shape == x2.shape and out2.dtype == x2.dtype
    assert bool(jnp.allclose(out2, jnp.clip(x2, min_val, max_val)))

    # 3) Larger slab (~2 MiB) -> tiled path with 1024-row blocks + ragged last block.
    x3 = jax.random.normal(k3, (8, 8, 130, 64), dtype=jnp.float32) * 3.0
    out3 = jax.block_until_ready(clipper_forward(x3, min_val, max_val))
    assert out3.shape == x3.shape and out3.dtype == x3.dtype
    assert bool(jnp.allclose(out3, jnp.clip(x3, min_val, max_val)))

    # inverse is identity
    inv = clipper_inverse(out1)
    assert bool(jnp.array_equal(inv, out1))

    print("KERNEL_OK")
</pallas_src>

<mosaic_0001>
module attributes {stable_mosaic.version = 11 : i64} {
  func.func @_clip_kernel(%arg0: i32, %arg1: memref<2xf32, #tpu.memory_space<smem>>, %arg2: memref<16x128xf32, #tpu.memory_space<vmem>>, %arg3: memref<16x128xf32, #tpu.memory_space<vmem>>) attributes {dimension_semantics = [#tpu.dimension_semantics<parallel>], iteration_bounds = array<i64: 1>, scalar_prefetch = 1 : i64, scratch_operands = 0 : i64, tpu.core_type = #tpu.core_type<tc>, window_params = [{transform_indices = @transform_0, window_bounds = array<i64: 16, 128>}, {transform_indices = @transform_1, window_bounds = array<i64: 16, 128>}]} {
    %c0 = arith.constant 0 : index
    %0 = memref.load %arg1[%c0] : memref<2xf32, #tpu.memory_space<smem>>
    %c1 = arith.constant 1 : index
    %1 = memref.load %arg1[%c1] : memref<2xf32, #tpu.memory_space<smem>>
    %c0_0 = arith.constant 0 : index
    %c0_1 = arith.constant 0 : index
    %2 = vector.load %arg2[%c0_0, %c0_1] : memref<16x128xf32, #tpu.memory_space<vmem>>, vector<16x128xf32>
    %3 = vector.broadcast %0 : f32 to vector<16x128xf32>
    %4 = arith.maximumf %2, %3 : vector<16x128xf32>
    %5 = vector.broadcast %1 : f32 to vector<16x128xf32>
    %6 = arith.minimumf %4, %5 : vector<16x128xf32>
    %c0_2 = arith.constant 0 : index
    %c0_3 = arith.constant 0 : index
    %7 = vector.load %arg3[%c0_2, %c0_3] : memref<16x128xf32, #tpu.memory_space<vmem>>, vector<16x128xf32>
    tpu.vector_store %arg3[%c0_2, %c0_3], %6 {strides = array<i32>} : memref<16x128xf32, #tpu.memory_space<vmem>>, vector<16x128xf32>,
    return
  }
  func.func @transform_0(%arg0: i32, %arg1: memref<2xf32, #tpu.memory_space<smem>>) -> (i32, i32) {
    %c0_i32 = arith.constant 0 : i32
    %c0_i32_0 = arith.constant 0 : i32
    return %arg0, %c0_i32 : i32, i32
  }
  func.func @transform_1(%arg0: i32, %arg1: memref<2xf32, #tpu.memory_space<smem>>) -> (i32, i32) {
    %c0_i32 = arith.constant 0 : i32
    %c0_i32_0 = arith.constant 0 : i32
    return %arg0, %c0_i32 : i32, i32
  }
}

</mosaic_0001>

<bundles_post_ra>
// kernel: tpu_custom_call.1
= control target key start
LH: loop header
LB: loop body
LE: loop exit
PB: predicated region body
PF: predicated region fallthrough
CT: control target
= control target key end

     0   :  { %s137_s12 = smov [#allocation3]   ;;  %s166_s0 = inlined_call_operand.hbm [shape: f32[2], index: 0, kind: input, shape index: {}]   ;;  %s167_s1 = inlined_call_operand.hbm [shape: f32[16,128], index: 1, kind: input, shape index: {}]   ;;  %s168_s2 = inlined_call_operand.hbm [shape: f32[16,128], index: 2, kind: output, shape index: {}]  }
   0x1   :  { %s8_s11 = sshll.u32 %s166_s0, 4  ;;  %s9_s11 = int_to_ptr.hbm [resolvable:$true] %s8_s11 }
   0x2   :  { %11 = dma.hbm_to_smem %s9_s11, 16, %s137_s12, [#allocation2] }
   0x3   :  { %131 = dma.done.wait [#allocation2], 16 }
   0x4   :  { %132 = vsyncadd [#allocation2], 4294967280 }
   0x5   :  { %14 = sfence }
   0x6   :  { %15 = vsyncpa [#allocation5], 0 }
   0x7   :  { %16 = vsyncpa [#allocation6], 0  ;;  %s21_s15 = sshll.u32 %s167_s1, 4  ;;  %s138_s16 = smov [#allocation4]   ;;  %s22_s15 = int_to_ptr.hbm [resolvable:$true] %s21_s15 }
   0x8   :  { %s23_s17 = sshll.u32 %s138_s16, 4  ;;  %s139_s18 = smov 128   ;;  %s24_s17 = int_to_ptr.vmem [resolvable:$true] %s23_s17 }
   0x9   :  { %s140_s19 = smov 8  }
   0xa   :  { %29 = dma.hbm_to_vmem [thread:$0]  %s22_s15, 256, %s24_s17, [#allocation5], %s139_s18, %s139_s18, %s140_s19  }
   0xb   :  { %133 = dma.done.wait [#allocation5], 256  }
   0xc   :  { %134 = vsyncadd [#allocation5], 4294967040  ;;  %s34_s0 = sld [smem:[#allocation3]]  ;;  %v36_v0 = vld [vmem:[#allocation4] sm:$0xff]  ;;  %v37_v2 = vld [vmem:[#allocation4 + $0x8] sm:$0xff]  ;;  %s141_s21 = smov [#allocation7]  }
   0xd   :  { %s65_s20 = sld [smem:[#allocation3 + $0x1]]  ;;  %s50_s22 = sshll.u32 %s141_s21, 4  ;;  %s51_s22 = int_to_ptr.vmem [resolvable:$true] %s50_s22 }
   0xe   :  { %s52_s24 = sshll.u32 %s168_s2, 4  ;;  %s53_s24 = int_to_ptr.hbm [resolvable:$true] %s52_s24 }
  0x12   :  { %v38_v1 = vstv %s34_s0 }
  0x13   :  { %v39_v3 = vmax.f32 %v36_v0, %v38_v1  ;;  %v41_v4 = vstv %s65_s20  ;;  %v40_v5 = vmax.f32 %v37_v2, %v38_v1 }
  0x15   :  { %v42_v6 = vmin.f32 %v39_v3, %v41_v4  ;;  %v43_v7 = vmin.f32 %v40_v5, %v41_v4 }
  0x17   :  { %44 = vst [vmem:[#allocation7] sm:$0xff] %v42_v6 }
  0x18   :  { %45 = vst [vmem:[#allocation7 + $0x8] sm:$0xff] %v43_v7 }
  0x19   :  { %58 = dma.vmem_to_hbm [thread:$0]  %s51_s22, 256, %s53_s24, [#allocation6], %s139_s18, %s139_s18, %s140_s19  }
  0x1a   :  { %135 = dma.done.wait [#allocation6], 256  }
  0x1b   :  { %136 = vsyncadd [#allocation6], 4294967040 }
  0x1c   :  { %63 = vsyncpa [#allocation5], 1 }
  0x1d   :  { %64 = vsyncpa [#allocation6], 1 }

</bundles_post_ra>
